<compile_context>
chip_gen: v7x
topology: tpu7x:2x2x1
jax: 0.10.0
libtpu: 0.0.40
codegen_flags: <defaults>
</compile_context>

<pallas_src>
import jax
import jax.numpy as jnp
from jax.experimental import pallas as pl
from jax.experimental.pallas import tpu as pltpu


def _srcmlp_kernel(x_ref, w1_ref, b1_ref, w2_ref, b2_ref, o_ref):
    # x_ref:  (tbf, fold*in_dim)          streamed batch tile (f32 or bf16)
    # w1_ref: (fold*in_dim, fold*hid)     block-diag W1.T, resident in VMEM
    # b1_ref: (1, fold*hid)               resident
    # w2_ref: (fold*hid, fold*out_dim)    block-diag W2.T, resident
    # b2_ref: (1, fold*out_dim)           resident
    # o_ref:  (tbf, fold*out_dim)         lane-dense output tile (128 lanes)
    x = x_ref[...]
    h = jnp.dot(x, w1_ref[...], preferred_element_type=jnp.float32)
    h = jnp.maximum(h + b1_ref[...], 0.0)                 # bias + ReLU (f32, VPU)
    # h stays f32 into the second matmul (no silent downcast).
    o = jnp.dot(h, w2_ref[...], preferred_element_type=jnp.float32)
    o_ref[...] = (o + b2_ref[...]).astype(o_ref.dtype)    # one unmasked dense store


def _round_up(n, m):
    return -(-n // m) * m


def src_mlp(emb_input, w1, b1, w2, b2, *, block_rows=4096, x_dtype=None):
    """Fused SrcMLP forward: ReLU(x @ W1.T + b1) @ W2.T + b2.

    emb_input: (B, in_dim)
    w1: (hid, in_dim),  b1: (hid,)       first Linear (PyTorch layout)
    w2: (out_dim, hid), b2: (out_dim,)   second Linear (PyTorch layout)
    block_rows: target batch rows per grid step.
    x_dtype:   streaming dtype for the activation (e.g. jnp.bfloat16); weights,
               accumulation and the output stay float32.
    returns (B, out_dim) float32
    """
    B, in_dim = emb_input.shape
    hid, in_dim_w = w1.shape
    out_dim, hid_w = w2.shape
    assert in_dim_w == in_dim and hid_w == hid
    assert b1.shape == (hid,) and b2.shape == (out_dim,)

    # ---- lane-dense folding: pack `fold` batch rows into one lane row ------
    fold = 128 // out_dim if (0 < out_dim <= 128 and 128 % out_dim == 0) else 1

    # Block-diagonal weights: x_folded @ kron(I_fold, W.T) computes `fold`
    # independent rows at once -> 128-lane output rows (unmasked stores) and
    # K = fold*in_dim for good MXU fill.  Tiny (<0.5 MiB) and VMEM-resident.
    eye = jnp.eye(fold, dtype=jnp.float32)
    w1_f = jnp.kron(eye, w1.T.astype(jnp.float32))        # (fold*in_dim, fold*hid)
    w2_f = jnp.kron(eye, w2.T.astype(jnp.float32))        # (fold*hid, fold*out_dim)
    b1_f = jnp.tile(b1.astype(jnp.float32), fold)[None, :]
    b2_f = jnp.tile(b2.astype(jnp.float32), fold)[None, :]

    # ---- tiling: big folded-row tiles, >=2 tiles when possible (v7x 2 TCs) --
    SUB = 8                                       # f32 sublane granularity
    rows_raw = -(-B // fold)                      # folded rows needed
    tbf_target = max(SUB, (block_rows // fold // SUB) * SUB)
    if rows_raw > 2 * SUB:
        grid_b = max(2, -(-rows_raw // tbf_target))
    else:
        grid_b = 1
    tbf = _round_up(-(-rows_raw // grid_b), SUB)  # balanced tile, multiple of 8
    rows = grid_b * tbf
    b_pad = rows * fold

    x = emb_input if x_dtype is None else emb_input.astype(x_dtype)
    if b_pad != B:
        x = jnp.pad(x, ((0, b_pad - B), (0, 0)))
    x_f = x.reshape(rows, fold * in_dim)          # free, contiguous reshape

    out_f = pl.pallas_call(
        _srcmlp_kernel,
        out_shape=jax.ShapeDtypeStruct((rows, fold * out_dim), jnp.float32),
        grid_spec=pltpu.PrefetchScalarGridSpec(
            num_scalar_prefetch=0,
            grid=(grid_b,),
            in_specs=[
                # x tile streams; weights/biases use constant index_maps so they
                # are DMA'd once and stay resident across grid steps.
                pl.BlockSpec((tbf, fold * in_dim), lambda i: (i, 0)),
                pl.BlockSpec((fold * in_dim, fold * hid), lambda i: (0, 0)),
                pl.BlockSpec((1, fold * hid), lambda i: (0, 0)),
                pl.BlockSpec((fold * hid, fold * out_dim), lambda i: (0, 0)),
                pl.BlockSpec((1, fold * out_dim), lambda i: (0, 0)),
            ],
            out_specs=pl.BlockSpec((tbf, fold * out_dim), lambda i: (i, 0)),
        ),
        compiler_params=pltpu.CompilerParams(
            # batch tiles are independent -> shard across v7x's 2 TensorCores
            dimension_semantics=("parallel",),
        ),
    )(x_f, w1_f, b1_f, w2_f, b2_f)

    out = out_f.reshape(b_pad, out_dim)           # free reshape back to (B, out_dim)
    return out if b_pad == B else out[:B]


if __name__ == "__main__":
    # Module hyper-parameters (small, deterministic).
    emb_dim, emb_num = 32, 2
    in_dim = emb_dim * emb_num       # 64
    hid = emb_dim * 2                # 64
    out_dim = emb_dim                # 32
    B = 16

    key = jax.random.PRNGKey(0)
    k_x, k_w1, k_b1, k_w2, k_b2 = jax.random.split(key, 5)

    # torch.nn.Linear default init: U(-1/sqrt(fan_in), 1/sqrt(fan_in)).
    lim1 = 1.0 / jnp.sqrt(jnp.float32(in_dim))
    lim2 = 1.0 / jnp.sqrt(jnp.float32(hid))
    w1 = jax.random.uniform(k_w1, (hid, in_dim), jnp.float32, -lim1, lim1)
    b1 = jax.random.uniform(k_b1, (hid,), jnp.float32, -lim1, lim1)
    w2 = jax.random.uniform(k_w2, (out_dim, hid), jnp.float32, -lim2, lim2)
    b2 = jax.random.uniform(k_b2, (out_dim,), jnp.float32, -lim2, lim2)
    x = jax.random.normal(k_x, (B, in_dim), dtype=jnp.float32)

    def ref_forward(xv):
        hp = jax.lax.Precision.HIGHEST
        h = jnp.maximum(jnp.dot(xv, w1.T, precision=hp) + b1, 0.0)
        return jnp.dot(h, w2.T, precision=hp) + b2

    # 1) Exact f32 path (module semantics preserved).
    out_f32 = jax.block_until_ready(src_mlp(x, w1, b1, w2, b2))
    ref_f32 = ref_forward(x)
    assert out_f32.shape == (B, out_dim), out_f32.shape
    assert jnp.allclose(out_f32, ref_f32, atol=1e-3, rtol=1e-3), "f32 path mismatch"

    # 2) bf16-streamed activation path (f32 accumulation & f32 output).
    out_bf = jax.block_until_ready(src_mlp(x, w1, b1, w2, b2, x_dtype=jnp.bfloat16))
    ref_q = ref_forward(x.astype(jnp.bfloat16).astype(jnp.float32))
    assert jnp.allclose(out_bf, ref_q, atol=1e-3, rtol=1e-3), "bf16 path mismatch"
    assert jnp.allclose(out_bf, ref_f32, atol=5e-2, rtol=5e-2), "bf16 path drift"

    print("KERNEL_OK")
</pallas_src>

<mosaic_0001>
module attributes {stable_mosaic.version = 11 : i64} {
  func.func @_srcmlp_kernel(%arg0: i32, %arg1: memref<8x256xf32, #tpu.memory_space<vmem>>, %arg2: memref<256x256xf32, #tpu.memory_space<vmem>>, %arg3: memref<1x256xf32, #tpu.memory_space<vmem>>, %arg4: memref<256x128xf32, #tpu.memory_space<vmem>>, %arg5: memref<1x128xf32, #tpu.memory_space<vmem>>, %arg6: memref<8x128xf32, #tpu.memory_space<vmem>>) attributes {dimension_semantics = [#tpu.dimension_semantics<parallel>], iteration_bounds = array<i64: 1>, scalar_prefetch = 0 : i64, scratch_operands = 0 : i64, tpu.core_type = #tpu.core_type<tc>, window_params = [{transform_indices = @transform_0, window_bounds = array<i64: 8, 256>}, {pipeline_mode = #tpu.pipeline_mode<synchronous>, transform_indices = @transform_1, window_bounds = array<i64: 256, 256>}, {pipeline_mode = #tpu.pipeline_mode<synchronous>, transform_indices = @transform_2, window_bounds = array<i64: 1, 256>}, {pipeline_mode = #tpu.pipeline_mode<synchronous>, transform_indices = @transform_3, window_bounds = array<i64: 256, 128>}, {pipeline_mode = #tpu.pipeline_mode<synchronous>, transform_indices = @transform_4, window_bounds = array<i64: 1, 128>}, {transform_indices = @transform_5, window_bounds = array<i64: 8, 128>}]} {
    %c0 = arith.constant 0 : index
    %c0_0 = arith.constant 0 : index
    %0 = vector.load %arg1[%c0, %c0_0] : memref<8x256xf32, #tpu.memory_space<vmem>>, vector<8x256xf32>
    %c0_1 = arith.constant 0 : index
    %c0_2 = arith.constant 0 : index
    %1 = vector.load %arg2[%c0_1, %c0_2] : memref<256x256xf32, #tpu.memory_space<vmem>>, vector<256x256xf32>
    %cst = arith.constant dense<0.000000e+00> : vector<8x256xf32>
    %2 = tpu.matmul %0, %1, %cst {dimension_numbers = #tpu.dot_dimension_numbers<[1], [0], [0], [1], [0, 0, 1, 1], [], []>} : vector<8x256xf32>, vector<256x256xf32>, vector<8x256xf32> -> vector<8x256xf32>
    %c0_3 = arith.constant 0 : index
    %c0_4 = arith.constant 0 : index
    %3 = vector.load %arg3[%c0_3, %c0_4] : memref<1x256xf32, #tpu.memory_space<vmem>>, vector<1x256xf32>
    %4 = vector.broadcast %3 : vector<1x256xf32> to vector<8x256xf32>
    %5 = arith.addf %2, %4 : vector<8x256xf32>
    %cst_5 = arith.constant 0.000000e+00 : f32
    %6 = vector.broadcast %cst_5 : f32 to vector<8x256xf32>
    %7 = arith.maximumf %5, %6 : vector<8x256xf32>
    %c0_6 = arith.constant 0 : index
    %c0_7 = arith.constant 0 : index
    %8 = vector.load %arg4[%c0_6, %c0_7] : memref<256x128xf32, #tpu.memory_space<vmem>>, vector<256x128xf32>
    %cst_8 = arith.constant dense<0.000000e+00> : vector<8x128xf32>
    %9 = tpu.matmul %7, %8, %cst_8 {dimension_numbers = #tpu.dot_dimension_numbers<[1], [0], [0], [1], [0, 0, 1, 1], [], []>} : vector<8x256xf32>, vector<256x128xf32>, vector<8x128xf32> -> vector<8x128xf32>
    %c0_9 = arith.constant 0 : index
    %c0_10 = arith.constant 0 : index
    %10 = vector.load %arg5[%c0_9, %c0_10] : memref<1x128xf32, #tpu.memory_space<vmem>>, vector<1x128xf32>
    %11 = vector.broadcast %10 : vector<1x128xf32> to vector<8x128xf32>
    %12 = arith.addf %9, %11 : vector<8x128xf32>
    %c0_11 = arith.constant 0 : index
    %c0_12 = arith.constant 0 : index
    %13 = vector.load %arg6[%c0_11, %c0_12] : memref<8x128xf32, #tpu.memory_space<vmem>>, vector<8x128xf32>
    tpu.vector_store %arg6[%c0_11, %c0_12], %12 {strides = array<i32>} : memref<8x128xf32, #tpu.memory_space<vmem>>, vector<8x128xf32>,
    return
  }
  func.func @transform_0(%arg0: i32) -> (i32, i32) {
    %c0_i32 = arith.constant 0 : i32
    %c0_i32_0 = arith.constant 0 : i32
    return %arg0, %c0_i32 : i32, i32
  }
  func.func @transform_1(%arg0: i32) -> (i32, i32) {
    %c0_i32 = arith.constant 0 : i32
    %c0_i32_0 = arith.constant 0 : i32
    %c0_i32_1 = arith.constant 0 : i32
    return %c0_i32, %c0_i32_0 : i32, i32
  }
  func.func @transform_2(%arg0: i32) -> (i32, i32) {
    %c0_i32 = arith.constant 0 : i32
    %c0_i32_0 = arith.constant 0 : i32
    %c0_i32_1 = arith.constant 0 : i32
    return %c0_i32, %c0_i32_0 : i32, i32
  }
  func.func @transform_3(%arg0: i32) -> (i32, i32) {
    %c0_i32 = arith.constant 0 : i32
    %c0_i32_0 = arith.constant 0 : i32
    %c0_i32_1 = arith.constant 0 : i32
    return %c0_i32, %c0_i32_0 : i32, i32
  }
  func.func @transform_4(%arg0: i32) -> (i32, i32) {
    %c0_i32 = arith.constant 0 : i32
    %c0_i32_0 = arith.constant 0 : i32
    %c0_i32_1 = arith.constant 0 : i32
    return %c0_i32, %c0_i32_0 : i32, i32
  }
  func.func @transform_5(%arg0: i32) -> (i32, i32) {
    %c0_i32 = arith.constant 0 : i32
    %c0_i32_0 = arith.constant 0 : i32
    return %arg0, %c0_i32 : i32, i32
  }
}

</mosaic_0001>

<bundles_post_ra>
// kernel: tpu_custom_call.1
= control target key start
LH: loop header
LB: loop body
LE: loop exit
PB: predicated region body
PF: predicated region fallthrough
CT: control target
= control target key end

     0   :  { %10 = vsyncpa [#allocation3], 0  ;;  %s663_s0 = inlined_call_operand.hbm [shape: f32[8,256], index: 0, kind: input, shape index: {}]   ;;  %s664_s1 = inlined_call_operand.hbm [shape: f32[256,256], index: 1, kind: input, shape index: {}]   ;;  %s665_s2 = inlined_call_operand.vmem [shape: f32[1,256], index: 2, kind: input, shape index: {}]   ;;  %s666_s3 = inlined_call_operand.hbm [shape: f32[256,128], index: 3, kind: input, shape index: {}]   ;;  %s667_s4 = inlined_call_operand.vmem [shape: f32[1,128], index: 4, kind: input, shape index: {}]   ;;  %s668_s5 = inlined_call_operand.hbm [shape: f32[8,128], index: 5, kind: output, shape index: {}]  }
   0x1   :  { %11 = vsyncpa [#allocation6], 0 }
   0x2   :  { %12 = vsyncpa [#allocation4], 0  ;;  %s571_s18 = smov [#allocation5]   ;;  %s477_s22 = scalar_lea.hbm %s664_s1, 8192 }
   0x3   :  { %s28_s19 = sshll.u32 %s571_s18, 4  ;;  %p478_p0 = scmp.ne.s32.totalorder %s664_s1, %s477_s22  ;;  %s29_s19 = int_to_ptr.vmem [resolvable:$true] %s28_s19 }
   0x4   :  { %p481_p1 = scmp.lt.u32.totalorder %s477_s22, %s664_s1 }
   0x6   :  { %p483_p2 = pnand %p481_p1, %p478_p0 }
   0x8   :  { %486 = shalt.err (!%p483_p2)
}
   0x9   :  { %s487_s27 = scalar_lea.vmem %s29_s19, 8192  ;;  %p492_p4 = scmp.lt.s32.totalorder %s29_s19, %s29_s19 }
   0xa   :  { %p488_p3 = scmp.ne.s32.totalorder %s29_s19, %s487_s27  ;;  %p493_p5 = scmp.lt.s32.totalorder %s487_s27, %s487_s27 }
   0xc   :  { %p494_p6 = por %p493_p5, %p492_p4 }
   0xe   :  { %p495_p7 = pnand %p494_p6, %p488_p3 }
  0x10   :  { %498 = shalt.err (!%p495_p7)
}
  0x11   :  { %s572_s28 = smov 256   ;;  %s573_s29 = smov 16  }
  0x12   :  { %34 = dma.hbm_to_vmem [thread:$0]  %s664_s1, 8192, %s29_s19, [#allocation6], %s572_s28, %s572_s28, %s573_s29  }
  0x13   :  { %s574_s7 = smov [#allocation2]   ;;  %s575_s9 = smov [#allocation7]  }
  0x14   :  { %s19_s8 = sshll.u32 %s574_s7, 4  ;;  %s42_s10 = sshll.u32 %s575_s9, 4  ;;  %s20_s8 = int_to_ptr.vmem [resolvable:$true] %s19_s8  ;;  %s43_s10 = int_to_ptr.vmem [resolvable:$true] %s42_s10 }
  0x15   :  { %s499_s13 = scalar_lea.hbm %s663_s0, 256 }
  0x16   :  { %p500_p8 = scmp.ne.s32.totalorder %s663_s0, %s499_s13  ;;  %p503_p9 = scmp.lt.u32.totalorder %s499_s13, %s663_s0 }
  0x18   :  { %p505_p10 = pnand %p503_p9, %p500_p8 }
  0x1a   :  { %508 = shalt.err (!%p505_p10)
}
  0x1b   :  { %s509_s1 = scalar_lea.vmem %s20_s8, 256  ;;  %p514_p12 = scmp.lt.s32.totalorder %s20_s8, %s20_s8 }
  0x1c   :  { %p510_p11 = scmp.ne.s32.totalorder %s20_s8, %s509_s1  ;;  %p515_p13 = scmp.lt.s32.totalorder %s509_s1, %s509_s1 }
  0x1e   :  { %p516_p0 = por %p515_p13, %p514_p12 }
  0x20   :  { %p517_p1 = pnand %p516_p0, %p510_p11 }
  0x22   :  { %520 = shalt.err (!%p517_p1)
}
  0x23   :  { %22 = dma.hbm_to_vmem [thread:$0]  %s663_s0, 256, %s20_s8, [#allocation3]  }
  0x24   :  { %s521_s22 = scalar_lea.hbm %s666_s3, 4096 }
  0x25   :  { %p522_p2 = scmp.ne.s32.totalorder %s666_s3, %s521_s22  ;;  %p525_p3 = scmp.lt.u32.totalorder %s521_s22, %s666_s3 }
  0x27   :  { %p527_p4 = pnand %p525_p3, %p522_p2 }
  0x29   :  { %530 = shalt.err (!%p527_p4)
}
  0x2a   :  { %s531_s27 = scalar_lea.vmem %s43_s10, 4096  ;;  %p536_p6 = scmp.lt.s32.totalorder %s43_s10, %s43_s10 }
  0x2b   :  { %p532_p5 = scmp.ne.s32.totalorder %s43_s10, %s531_s27  ;;  %p537_p7 = scmp.lt.s32.totalorder %s531_s27, %s531_s27 }
  0x2d   :  { %p538_p8 = por %p537_p7, %p536_p6 }
  0x2f   :  { %p539_p9 = pnand %p538_p8, %p532_p5 }
  0x31   :  { %542 = shalt.err (!%p539_p9)
}
  0x32   :  { %s576_s0 = smov 128   ;;  %s577_s28 = smov 8  }
  0x33   :  { %48 = dma.hbm_to_vmem [thread:$0]  %s666_s3, 4096, %s43_s10, [#allocation6], %s576_s0, %s576_s0, %s577_s28  }
  0x34   :  { %565 = dma.done.wait [#allocation3], 256  }
  0x35   :  { %566 = vsyncadd [#allocation3], 4294967040 }
  0x36   :  { %567 = dma.done.wait [#allocation6], 12288  }
  0x37   :  { %568 = vsyncadd [#allocation6], 4294955008  ;;  %v63_v0 = vld [vmem:[#allocation5 + $0x8] sm:$0xff]  ;;  %v65_v1 = vld [vmem:[#allocation5 + $0x18] sm:$0xff]  ;;  %s578_s9 = smov [#allocation8]  }
  0x38   :  { %v62_v2 = vld [vmem:[#allocation5] sm:$0xff]  ;;  %v373_v3 = vpack.c.bf16 %v65_v1, %v63_v0  ;;  %v64_v4 = vld [vmem:[#allocation5 + $0x10] sm:$0xff]  ;;  %v67_v5 = vld [vmem:[#allocation5 + $0x28] sm:$0xff]  ;;  %s327_s10 = sshll.u32 %s578_s9, 4  ;;  %s328_s10 = int_to_ptr.vmem [resolvable:$true] %s327_s10 }
  0x39   :  { %v69_v6 = vld [vmem:[#allocation5 + $0x38] sm:$0xff]  ;;  %v375_v7 = vpack.c.bf16 %v64_v4, %v62_v2  ;;  %v66_v9 = vld [vmem:[#allocation5 + $0x20] sm:$0xff]  ;;  %v68_v10 = vld [vmem:[#allocation5 + $0x30] sm:$0xff]  ;;  %p548_p11 = scmp.lt.s32.totalorder %s328_s10, %s328_s10 }
  0x3a   :  { %v377_v8 = vpack.c.bf16 %v69_v6, %v67_v5  ;;  %v71_v11 = vld [vmem:[#allocation5 + $0x48] sm:$0xff]  ;;  %374 = vmatprep.subr.bf16.mxu0 %v373_v3  ;;  %v73_v12 = vld [vmem:[#allocation5 + $0x58] sm:$0xff]  ;;  %v379_v13 = vpack.c.bf16 %v68_v10, %v66_v9  ;;  %v70_v15 = vld [vmem:[#allocation5 + $0x40] sm:$0xff] }
  0x3b   :  { %376 = vmatpush1.bf16.msra.mxu0 %v375_v7  ;;  %v381_v14 = vpack.c.bf16 %v73_v12, %v71_v11  ;;  %v72_v16 = vld [vmem:[#allocation5 + $0x50] sm:$0xff]  ;;  %v75_v17 = vld [vmem:[#allocation5 + $0x68] sm:$0xff]  ;;  %v77_v18 = vld [vmem:[#allocation5 + $0x78] sm:$0xff] }
  0x3c   :  { %378 = vmatprep.subr.bf16.mxu0 %v377_v8  ;;  %v383_v19 = vpack.c.bf16 %v72_v16, %v70_v15  ;;  %v385_v20 = vpack.c.bf16 %v77_v18, %v75_v17  ;;  %v74_v21 = vld [vmem:[#allocation5 + $0x60] sm:$0xff]  ;;  %v76_v22 = vld [vmem:[#allocation5 + $0x70] sm:$0xff]  ;;  %v79_v23 = vld [vmem:[#allocation5 + $0x88] sm:$0xff] }
  0x3d   :  { %v81_v24 = vld [vmem:[#allocation5 + $0x98] sm:$0xff]  ;;  %v387_v25 = vpack.c.bf16 %v76_v22, %v74_v21  ;;  %v78_v27 = vld [vmem:[#allocation5 + $0x80] sm:$0xff]  ;;  %v80_v28 = vld [vmem:[#allocation5 + $0x90] sm:$0xff] }
  0x3e   :  { %v389_v26 = vpack.c.bf16 %v81_v24, %v79_v23  ;;  %v83_v29 = vld [vmem:[#allocation5 + $0xa8] sm:$0xff]  ;;  %v85_v30 = vld [vmem:[#allocation5 + $0xb8] sm:$0xff]  ;;  %v391_v31 = vpack.c.bf16 %v80_v28, %v78_v27  ;;  %v82_v33 = vld [vmem:[#allocation5 + $0xa0] sm:$0xff] }
  0x3f   :  { %380 = vmatpush1.bf16.msra.mxu0 %v379_v13  ;;  %v393_v32 = vpack.c.bf16 %v85_v30, %v83_v29  ;;  %v84_v34 = vld [vmem:[#allocation5 + $0xb0] sm:$0xff]  ;;  %v87_v35 = vld [vmem:[#allocation5 + $0xc8] sm:$0xff]  ;;  %v89_v36 = vld [vmem:[#allocation5 + $0xd8] sm:$0xff] }
  0x40   :  { %382 = vmatprep.subr.bf16.mxu0 %v381_v14  ;;  %v395_v37 = vpack.c.bf16 %v84_v34, %v82_v33  ;;  %v86_v38 = vld [vmem:[#allocation5 + $0xc0] sm:$0xff]  ;;  %v88_v39 = vld [vmem:[#allocation5 + $0xd0] sm:$0xff]  ;;  %v397_v40 = vpack.c.bf16 %v89_v36, %v87_v35  ;;  %v91_v41 = vld [vmem:[#allocation5 + $0xe8] sm:$0xff] }
  0x41   :  { %v93_v42 = vld [vmem:[#allocation5 + $0xf8] sm:$0xff]  ;;  %v227_v44 = vld [vmem:[#allocation7 + $0x80] sm:$0xff]  ;;  %v228_v45 = vld [vmem:[#allocation7 + $0x88] sm:$0xff]  ;;  %v399_v51 = vpack.c.bf16 %v88_v39, %v86_v38 }
  0x42   :  { %v61_v43 = vld [vmem:[#allocation2 + $0x8] sm:$0xff]  ;;  %v211_v46 = vld [vmem:[#allocation7] sm:$0xff]  ;;  %v437_v47 = vpack.c.bf16 %v228_v45, %v227_v44  ;;  %v212_v48 = vld [vmem:[#allocation7 + $0x8] sm:$0xff]  ;;  %v401_v57 = vpack.c.bf16 %v93_v42, %v91_v41 }
  0x43   :  { %384 = vmatpush1.bf16.msra.mxu0 %v383_v19  ;;  %202 = vmatprep.mubr.f32.mxu0 %v61_v43  ;;  %v229_v49 = vld [vmem:[#allocation7 + $0x90] sm:$0xff]  ;;  %v230_v50 = vld [vmem:[#allocation7 + $0x98] sm:$0xff]  ;;  %v439_v52 = vpack.c.bf16 %v212_v48, %v211_v46  ;;  %v231_v56 = vld [vmem:[#allocation7 + $0xa0] sm:$0xff] }
  0x44   :  { %386 = vmatprep.subr.bf16.mxu0 %v385_v20  ;;  %v441_v53 = vpack.c.bf16 %v230_v50, %v229_v49  ;;  %v213_v54 = vld [vmem:[#allocation7 + $0x10] sm:$0xff]  ;;  %v214_v55 = vld [vmem:[#allocation7 + $0x18] sm:$0xff]  ;;  %v90_v58 = vld [vmem:[#allocation5 + $0xe0] sm:$0xff]  ;;  %438 = vmatprep.subr.bf16.mxu1 %v437_v47 }
  0x45   :  { %v92_v59 = vld [vmem:[#allocation5 + $0xf0] sm:$0xff]  ;;  %v232_v60 = vld [vmem:[#allocation7 + $0xa8] sm:$0xff]  ;;  %v97_v62 = vld [vmem:[#allocation5 + $0x118] sm:$0xff]  ;;  %440 = vmatpush3.bf16.msra.mxu1 %v439_v52  ;;  %v443_v63 = vpack.c.bf16 %v214_v55, %v213_v54 }
  0x46   :  { %v95_v61 = vld [vmem:[#allocation5 + $0x108] sm:$0xff]  ;;  %442 = vmatprep.subr.bf16.mxu1 %v441_v53  ;;  %v445_v0 = vpack.c.bf16 %v232_v60, %v231_v56  ;;  %v215_v1 = vld [vmem:[#allocation7 + $0x20] sm:$0xff]  ;;  %v403_v3 = vpack.c.bf16 %v92_v59, %v90_v58  ;;  %v233_v4 = vld [vmem:[#allocation7 + $0xb0] sm:$0xff] }
  0x47   :  { %388 = vmatpush1.bf16.msra.mxu0 %v387_v25  ;;  %v216_v2 = vld [vmem:[#allocation7 + $0x28] sm:$0xff]  ;;  %v234_v5 = vld [vmem:[#allocation7 + $0xb8] sm:$0xff]  ;;  %v405_v6 = vpack.c.bf16 %v97_v62, %v95_v61  ;;  %v94_v7 = vld [vmem:[#allocation5 + $0x100] sm:$0xff] }
  0x48   :  { %390 = vmatprep.subr.bf16.mxu0 %v389_v26  ;;  %v96_v8 = vld [vmem:[#allocation5 + $0x110] sm:$0xff]  ;;  %v99_v9 = vld [vmem:[#allocation5 + $0x128] sm:$0xff]  ;;  %v101_v10 = vld [vmem:[#allocation5 + $0x138] sm:$0xff]  ;;  %v447_v11 = vpack.c.bf16 %v216_v2, %v215_v1  ;;  %v449_v12 = vpack.c.bf16 %v234_v5, %v233_v4 }
  0x49   :  { %444 = vmatpush3.bf16.msra.mxu1 %v443_v63  ;;  %v217_v13 = vld [vmem:[#allocation7 + $0x30] sm:$0xff]  ;;  %v218_v14 = vld [vmem:[#allocation7 + $0x38] sm:$0xff]  ;;  %v407_v15 = vpack.c.bf16 %v96_v8, %v94_v7  ;;  %v235_v16 = vld [vmem:[#allocation7 + $0xc0] sm:$0xff]  ;;  %v409_v18 = vpack.c.bf16 %v101_v10, %v99_v9 }
  0x4a   :  { %446 = vmatprep.subr.bf16.mxu1 %v445_v0  ;;  %v236_v17 = vld [vmem:[#allocation7 + $0xc8] sm:$0xff]  ;;  %v98_v19 = vld [vmem:[#allocation5 + $0x120] sm:$0xff]  ;;  %v100_v20 = vld [vmem:[#allocation5 + $0x130] sm:$0xff]  ;;  %v451_v23 = vpack.c.bf16 %v218_v14, %v217_v13 }
  0x4b   :  { %392 = vmatpush1.bf16.msra.mxu0 %v391_v31  ;;  %v103_v21 = vld [vmem:[#allocation5 + $0x148] sm:$0xff]  ;;  %v105_v22 = vld [vmem:[#allocation5 + $0x158] sm:$0xff]  ;;  %v453_v24 = vpack.c.bf16 %v236_v17, %v235_v16  ;;  %v219_v25 = vld [vmem:[#allocation7 + $0x40] sm:$0xff]  ;;  %v411_v27 = vpack.c.bf16 %v100_v20, %v98_v19 }
  0x4c   :  { %394 = vmatprep.subr.bf16.mxu0 %v393_v32  ;;  %v220_v26 = vld [vmem:[#allocation7 + $0x48] sm:$0xff]  ;;  %v237_v28 = vld [vmem:[#allocation7 + $0xd0] sm:$0xff]  ;;  %v238_v29 = vld [vmem:[#allocation7 + $0xd8] sm:$0xff]  ;;  %v413_v30 = vpack.c.bf16 %v105_v22, %v103_v21 }
  0x4d   :  { %448 = vmatpush3.bf16.msra.mxu1 %v447_v11  ;;  %v102_v31 = vld [vmem:[#allocation5 + $0x140] sm:$0xff]  ;;  %v104_v32 = vld [vmem:[#allocation5 + $0x150] sm:$0xff]  ;;  %v107_v33 = vld [vmem:[#allocation5 + $0x168] sm:$0xff]  ;;  %v455_v35 = vpack.c.bf16 %v220_v26, %v219_v25  ;;  %v457_v36 = vpack.c.bf16 %v238_v29, %v237_v28 }
  0x4e   :  { %450 = vmatprep.subr.bf16.mxu1 %v449_v12  ;;  %v109_v34 = vld [vmem:[#allocation5 + $0x178] sm:$0xff]  ;;  %v415_v39 = vpack.c.bf16 %v104_v32, %v102_v31  ;;  %v240_v41 = vld [vmem:[#allocation7 + $0xe8] sm:$0xff]  ;;  %v106_v43 = vld [vmem:[#allocation5 + $0x160] sm:$0xff] }
  0x4f   :  { %396 = vmatpush1.bf16.msra.mxu0 %v395_v37  ;;  %v221_v37 = vld [vmem:[#allocation7 + $0x50] sm:$0xff]  ;;  %v222_v38 = vld [vmem:[#allocation7 + $0x58] sm:$0xff]  ;;  %v417_v42 = vpack.c.bf16 %v109_v34, %v107_v33  ;;  %v111_v45 = vld [vmem:[#allocation5 + $0x188] sm:$0xff] }
  0x50   :  { %398 = vmatprep.subr.bf16.mxu0 %v397_v40  ;;  %v239_v40 = vld [vmem:[#allocation7 + $0xe0] sm:$0xff]  ;;  %v108_v44 = vld [vmem:[#allocation5 + $0x170] sm:$0xff]  ;;  %v113_v46 = vld [vmem:[#allocation5 + $0x198] sm:$0xff]  ;;  %v459_v47 = vpack.c.bf16 %v222_v38, %v221_v37 }
  0x51   :  { %452 = vmatpush3.bf16.msra.mxu1 %v451_v23  ;;  %v461_v48 = vpack.c.bf16 %v240_v41, %v239_v40  ;;  %v419_v49 = vpack.c.bf16 %v108_v44, %v106_v43  ;;  %v421_v50 = vpack.c.bf16 %v113_v46, %v111_v45  ;;  %v112_v52 = vld [vmem:[#allocation5 + $0x190] sm:$0xff]  ;;  %v115_v53 = vld [vmem:[#allocation5 + $0x1a8] sm:$0xff]  ;;  %v117_v54 = vld [vmem:[#allocation5 + $0x1b8] sm:$0xff] }
  0x52   :  { %454 = vmatprep.subr.bf16.mxu1 %v453_v24  ;;  %v425_v56 = vpack.c.bf16 %v117_v54, %v115_v53  ;;  %v116_v58 = vld [vmem:[#allocation5 + $0x1b0] sm:$0xff]  ;;  %v119_v59 = vld [vmem:[#allocation5 + $0x1c8] sm:$0xff]  ;;  %v121_v60 = vld [vmem:[#allocation5 + $0x1d8] sm:$0xff] }
  0x53   :  { %400 = vmatpush1.bf16.msra.mxu0 %v399_v51  ;;  %v110_v51 = vld [vmem:[#allocation5 + $0x180] sm:$0xff]  ;;  %v429_v62 = vpack.c.bf16 %v121_v60, %v119_v59  ;;  %v120_v0 = vld [vmem:[#allocation5 + $0x1d0] sm:$0xff]  ;;  %v123_v1 = vld [vmem:[#allocation5 + $0x1e8] sm:$0xff] }
  0x54   :  { %402 = vmatprep.subr.bf16.mxu0 %v401_v57  ;;  %v423_v55 = vpack.c.bf16 %v112_v52, %v110_v51  ;;  %v114_v57 = vld [vmem:[#allocation5 + $0x1a0] sm:$0xff]  ;;  %v125_v2 = vld [vmem:[#allocation5 + $0x1f8] sm:$0xff]  ;;  %v60_v8 = vld [vmem:[#allocation2] sm:$0xff] }
  0x55   :  { %456 = vmatpush3.bf16.msra.mxu1 %v455_v35  ;;  %v427_v61 = vpack.c.bf16 %v116_v58, %v114_v57  ;;  %v118_v63 = vld [vmem:[#allocation5 + $0x1c0] sm:$0xff]  ;;  %v433_v4 = vpack.c.bf16 %v125_v2, %v123_v1  ;;  %v224_v10 = vld [vmem:[#allocation7 + $0x68] sm:$0xff]  ;;  %v241_v12 = vld [vmem:[#allocation7 + $0xf0] sm:$0xff] }
  0x56   :  { %458 = vmatprep.subr.bf16.mxu1 %v457_v36  ;;  %v122_v5 = vld [vmem:[#allocation5 + $0x1e0] sm:$0xff]  ;;  %v242_v13 = vld [vmem:[#allocation7 + $0xf8] sm:$0xff]  ;;  %v126_v21 = vld [vmem:[%s665_s2] sm:$0x3]  ;;  %s543_s2 = scalar_lea.vmem %s328_s10, 128 }
  0x57   :  { %404 = vmatpush1.bf16.msra.mxu0 %v403_v3  ;;  %v431_v3 = vpack.c.bf16 %v120_v0, %v118_v63  ;;  %v223_v9 = vld [vmem:[#allocation7 + $0x60] sm:$0xff]  ;;  %v465_v14 = vpack.c.bf16 %v242_v13, %v241_v12  ;;  %v226_v16 = vld [vmem:[#allocation7 + $0x78] sm:$0xff]  ;;  %v337_v32 = vld [vmem:[%s667_s4] ss:$0 sm:$0xff]  ;;  %p544_p10 = scmp.ne.s32.totalorder %s328_s10, %s543_s2  ;;  %p549_p12 = scmp.lt.s32.totalorder %s543_s2, %s543_s2 }
  0x58   :  { %406 = vmatprep.subr.bf16.mxu0 %v405_v6  ;;  %v124_v6 = vld [vmem:[#allocation5 + $0x1f0] sm:$0xff]  ;;  %v463_v11 = vpack.c.bf16 %v224_v10, %v223_v9 }
  0x59   :  { %460 = vmatpush3.bf16.msra.mxu1 %v459_v47  ;;  %v435_v7 = vpack.c.bf16 %v124_v6, %v122_v5  ;;  %p550_p13 = por %p549_p12, %p548_p11 }
  0x5a   :  { %462 = vmatprep.subr.bf16.mxu1 %v461_v48 }
  0x5b   :  { %408 = vmatpush1.bf16.msra.mxu0 %v407_v15  ;;  %v225_v15 = vld [vmem:[#allocation7 + $0x70] sm:$0xff]  ;;  %p551_p0 = pnand %p550_p13, %p544_p10 }
  0x5c   :  { %410 = vmatprep.subr.bf16.mxu0 %v409_v18  ;;  %v467_v17 = vpack.c.bf16 %v226_v16, %v225_v15  ;;  %v128_v18 = vlaneseq }
  0x5d   :  { %464 = vmatpush3.bf16.msra.mxu1 %v463_v11 }
  0x5e   :  { %466 = vmatprep.subr.bf16.mxu1 %v465_v14  ;;  %v129_v19 = vshrl.u32 %v128_v18, 7 }
  0x5f   :  { %412 = vmatpush1.bf16.msra.mxu0 %v411_v27 }
  0x60   :  { %414 = vmatprep.subr.bf16.mxu0 %v413_v30  ;;  %v130_v20 = vsub.s32 0, %v129_v19  ;;  %v134_v22 = vsub.s32 1, %v129_v19 }
  0x61   :  { %468 = vmatpush3.bf16.msra.mxu1 %v467_v17 }
  0x62   :  { %v131_v23 = vrot.slane %v126_v21, %v130_v20  ;;  %v135_v24 = vrot.slane %v126_v21, %v134_v22 }
  0x63   :  { %416 = vmatpush1.bf16.msra.mxu0 %v415_v39 }
  0x64   :  { %418 = vmatprep.subr.bf16.mxu0 %v417_v42 }
  0x67   :  { %420 = vmatpush1.bf16.msra.mxu0 %v419_v49 }
  0x68   :  { %422 = vmatprep.subr.bf16.mxu0 %v421_v50 }
  0x6b   :  { %424 = vmatpush1.bf16.msra.mxu0 %v423_v55 }
  0x6c   :  { %426 = vmatprep.subr.bf16.mxu0 %v425_v56 }
  0x6f   :  { %428 = vmatpush1.bf16.msra.mxu0 %v427_v61 }
  0x70   :  { %430 = vmatprep.subr.bf16.mxu0 %v429_v62 }
  0x73   :  { %432 = vmatpush1.bf16.msra.mxu0 %v431_v3 }
  0x74   :  { %434 = vmatprep.subr.bf16.mxu0 %v433_v4 }
  0x77   :  { %436 = vmatpush1.bf16.msra.mxu0 %v435_v7 }
  0x7a   :  { %203 = vmatmul.mubr.f32.vlgmr.msra.gmra.mrb[0].mxu0 %v60_v8 }
 0x14d   :  { %v204_v25 = vpop.f32.mrb[0].mxu0 }
 0x14e   :  { %v205_v26 = vadd.f32 %v204_v25, %v131_v23  ;;  %v206_v27 = vpop.f32.mrb[1].mxu0 }
 0x14f   :  { %v207_v28 = vadd.f32 %v206_v27, %v135_v24 }
 0x150   :  { %v209_v30 = vmax.f32 %v205_v26, 0.0 }
 0x151   :  { %v210_v29 = vmax.f32 %v207_v28, 0.0 }
 0x153   :  { %314 = vmatprep.mubr.f32.mxu1 %v210_v29 }
 0x154   :  { %315 = vmatmul.mubr.f32.vlgmr.msra.gmra.mrb[0].mxu1 %v209_v30 }
 0x227   :  { %v370_v31 = vpop.f32.mrb[0].mxu1 }
 0x228   :  { %v371_v33 = vpop.f32.mrb[1].mxu1 }
 0x229   :  { %v372_v34 = vadd.f32 %v371_v33, %v370_v31 }
 0x22b   :  { %v317_v35 = vadd.f32 %v372_v34, %v337_v32 }
 0x22d   :  { %320 = vst [vmem:[#allocation8] sm:$0xff] %v317_v35 }
 0x22e   :  { %554 = shalt.err (!%p551_p0)
}
 0x22f   :  { %s555_s13 = scalar_lea.hbm %s668_s5, 128 }
 0x230   :  { %p556_p1 = scmp.ne.s32.totalorder %s668_s5, %s555_s13  ;;  %p559_p2 = scmp.lt.u32.totalorder %s555_s13, %s668_s5 }
 0x232   :  { %p561_p3 = pnand %p559_p2, %p556_p1 }
 0x234   :  { %564 = shalt.err (!%p561_p3)
}
 0x235   :  { %330 = dma.vmem_to_hbm [thread:$0]  %s328_s10, 128, %s668_s5, [#allocation4]  }
 0x236   :  { %569 = dma.done.wait [#allocation4], 128  }
 0x237   :  { %570 = vsyncadd [#allocation4], 4294967168 }
 0x238   :  { %334 = vsyncpa [#allocation3], 1 }
 0x239   :  { %335 = vsyncpa [#allocation6], 1 }
 0x23a   :  { %336 = vsyncpa [#allocation4], 1 }

</bundles_post_ra>
